<compile_context>
chip_gen: v7x
topology: tpu7x:2x2x1
jax: 0.10.0
libtpu: 0.0.40
codegen_flags: <defaults>
</compile_context>

<pallas_src>
import functools

import jax
import jax.numpy as jnp
from jax.experimental import pallas as pl
from jax.experimental.pallas import tpu as pltpu

TILE_DST = 128       # dst-node tile (sublanes of the logit tile)
SUB_SRC = 128        # src-node sub-tile (lanes of the logit tile)
MAX_SRC_BLOCK = 512  # src nodes DMA'd per grid step (amortizes ~0.35us/step)
NEG_BIG = -1e30      # additive mask value; NOT -inf (inf - inf would NaN)


def _round_up(x, m):
    return ((x + m - 1) // m) * m


def _pick_src_block(n_pad):
    blk = min(MAX_SRC_BLOCK, n_pad)
    while n_pad % blk:
        blk -= SUB_SRC
    return blk


# --------------------------- linear (MXU) kernels ----------------------------

def _linear_kernel(x_ref, w_ref, b_ref, o_ref):
    # bf16 operands on the MXU, f32 accumulation, f32 bias add.
    o_ref[...] = (
        jnp.dot(x_ref[...].astype(jnp.bfloat16),
                w_ref[...].astype(jnp.bfloat16),
                preferred_element_type=jnp.float32)
        + b_ref[...])


def pallas_linear(x, w, b, row_tile=256):
    """y = x @ w + b, rows tiled; no padding to a full 256-row tile for tiny n."""
    n, d = x.shape
    dout = w.shape[1]
    tr = min(row_tile, _round_up(n, 8))
    n_pad = _round_up(n, tr)
    if n_pad != n:
        x = jnp.pad(x, ((0, n_pad - n), (0, 0)))
    out = pl.pallas_call(
        _linear_kernel,
        out_shape=jax.ShapeDtypeStruct((n_pad, dout), jnp.float32),
        grid_spec=pltpu.PrefetchScalarGridSpec(
            num_scalar_prefetch=0,
            grid=(pl.cdiv(n_pad, tr),),
            in_specs=[
                pl.BlockSpec((tr, d), lambda i: (i, 0)),
                pl.BlockSpec((d, dout), lambda i: (0, 0)),
                pl.BlockSpec((1, dout), lambda i: (0, 0)),
            ],
            out_specs=pl.BlockSpec((tr, dout), lambda i: (i, 0)),
        ),
        compiler_params=pltpu.CompilerParams(
            dimension_semantics=("parallel",)),
    )(x, w, b.astype(jnp.float32)[None, :])
    return out[:n]


def _gat_proj_kernel(x_ref, w_ref, b_ref, xl_ref, xr_ref, xlv_ref, *, hc):
    y = (jnp.dot(x_ref[...].astype(jnp.bfloat16),
                 w_ref[...].astype(jnp.bfloat16),
                 preferred_element_type=jnp.float32)
         + b_ref[...])
    xl = y[:, :hc]
    xl_ref[...] = xl
    xr_ref[...] = y[:, hc:]
    xlv_ref[...] = xl.astype(jnp.bfloat16)   # value matrix, no extra XLA pass


def pallas_gat_projection(x, wl, bl, wr, br, row_tile=256):
    """Fused lin_l|lin_r projection emitting (xl_f32, xr_f32, xl_bf16)."""
    n, d = x.shape
    hc = wl.shape[1]
    w = jnp.concatenate([wl, wr], axis=1)
    b = jnp.concatenate([bl, br], axis=0)
    tr = min(row_tile, _round_up(n, 8))
    n_pad = _round_up(n, tr)
    if n_pad != n:
        x = jnp.pad(x, ((0, n_pad - n), (0, 0)))
    kernel = functools.partial(_gat_proj_kernel, hc=hc)
    xl, xr, xlv = pl.pallas_call(
        kernel,
        out_shape=(jax.ShapeDtypeStruct((n_pad, hc), jnp.float32),
                   jax.ShapeDtypeStruct((n_pad, hc), jnp.float32),
                   jax.ShapeDtypeStruct((n_pad, hc), jnp.bfloat16)),
        grid_spec=pltpu.PrefetchScalarGridSpec(
            num_scalar_prefetch=0,
            grid=(pl.cdiv(n_pad, tr),),
            in_specs=[
                pl.BlockSpec((tr, d), lambda i: (i, 0)),
                pl.BlockSpec((d, 2 * hc), lambda i: (0, 0)),
                pl.BlockSpec((1, 2 * hc), lambda i: (0, 0)),
            ],
            out_specs=[pl.BlockSpec((tr, hc), lambda i: (i, 0)),
                       pl.BlockSpec((tr, hc), lambda i: (i, 0)),
                       pl.BlockSpec((tr, hc), lambda i: (i, 0))],
        ),
        compiler_params=pltpu.CompilerParams(
            dimension_semantics=("parallel",)),
    )(x, w, b.astype(jnp.float32)[None, :])
    return xl[:n], xr[:n], xlv[:n]


# ------------------------- GATv2 attention kernel ----------------------------

def _gatv2_attn_kernel(att_ref, xr_ref, xlT_ref, xlv_ref, adj_ref, o_ref,
                       m_sc, l_sc, acc_sc, *, heads, chan, sub_tiles, sub_w):
    # att_ref : SMEM [H*C] f32        attention vector, head-major
    # xr_ref  : [TI, H*C] f32         lin_r(x) for target nodes
    # xlT_ref : [H*C, TJ_BLK] f32     lin_l(x)^T for source nodes (src on lanes)
    # xlv_ref : [TJ_BLK, H*C] bf16    lin_l(x) value matrix for aggregation
    # adj_ref : [TI, TJ_BLK] int8     adj[i, j] = 1 iff edge j -> i (+self loop)
    # o_ref   : [TI, H*C] f32         aggregated output (concat layout)
    # scratch : [TI, H*C] f32 each    running max / denom (head-repeated), acc
    j = pl.program_id(1)
    nj = pl.num_programs(1)

    @pl.when(j == 0)
    def _init():
        m_sc[...] = jnp.full(m_sc.shape, NEG_BIG, jnp.float32)
        l_sc[...] = jnp.zeros(l_sc.shape, jnp.float32)
        acc_sc[...] = jnp.zeros(acc_sc.shape, jnp.float32)

    xr = xr_ref[...]                 # [TI, H*C]
    xlT_blk = xlT_ref[...]           # [H*C, TJ_BLK]
    xlv_blk = xlv_ref[...]           # [TJ_BLK, H*C] bf16
    neg_slope = jnp.float32(0.2)

    # Static loop over 128-wide src sub-tiles: wide DMA block per grid step,
    # but the [TI, sub_w] f32 logit temp stays at 16 vregs (no spills).
    for sub in range(sub_tiles):
        lo = sub * sub_w
        xlT = xlT_blk[:, lo:lo + sub_w]           # [H*C, sub_w]
        vv = xlv_blk[lo:lo + sub_w, :]            # [sub_w, H*C] bf16
        # Additive mask tile: computed once per sub-tile, used as the logit
        # accumulator init (replaces a per-head post-accumulation where).
        addmask = jnp.where(adj_ref[:, lo:lo + sub_w] != 0,
                            jnp.float32(0.0), jnp.float32(NEG_BIG))

        m_prev = m_sc[...]                        # [TI, H*C] head-repeated
        m_new_parts, sum_parts, contrib_parts = [], [], []
        for h in range(heads):
            logit = addmask
            for c in range(chan):
                k = h * chan + c
                s = xlT[k:k + 1, :] + xr[:, k:k + 1]          # [TI, sub_w]
                # leaky_relu(s) = max(s, 0.2*s)  (one mul + one max, no select)
                logit = logit + att_ref[k] * jnp.maximum(s, neg_slope * s)
            m_prev_h = m_prev[:, h * chan:h * chan + 1]       # [TI, 1]
            m_new_h = jnp.maximum(m_prev_h,
                                  jnp.max(logit, axis=-1, keepdims=True))
            p = jnp.exp(logit - m_new_h)                      # masked -> 0
            sum_h = jnp.sum(p, axis=-1, keepdims=True)
            contrib_parts.append(
                jnp.dot(p.astype(jnp.bfloat16),
                        vv[:, h * chan:(h + 1) * chan],
                        preferred_element_type=jnp.float32))
            ti_rows = m_new_h.shape[0]
            m_new_parts.append(jnp.broadcast_to(m_new_h, (ti_rows, chan)))
            sum_parts.append(jnp.broadcast_to(sum_h, (ti_rows, chan)))

        # Batched full-lane-width scratch updates (one store each, no masked
        # per-head vst read-modify-writes).
        m_new = jnp.concatenate(m_new_parts, axis=1)          # [TI, H*C]
        scale = jnp.exp(m_prev - m_new)                       # [TI, H*C]
        l_sc[...] = scale * l_sc[...] + jnp.concatenate(sum_parts, axis=1)
        acc_sc[...] = scale * acc_sc[...] + jnp.concatenate(contrib_parts,
                                                            axis=1)
        m_sc[...] = m_new

    @pl.when(j == nj - 1)
    def _finalize():
        inv = pl.reciprocal(jnp.maximum(l_sc[...], jnp.float32(1e-20)),
                            approx=True)
        o_ref[...] = (acc_sc[...] * inv).astype(o_ref.dtype)


def pallas_gatv2_attention(att, xr, xlT, xlv, adj_i8, heads, chan):
    n_pad, hcdim = xr.shape
    ti = min(TILE_DST, n_pad)
    tj_blk = _pick_src_block(n_pad)
    sub_w = min(SUB_SRC, tj_blk)
    sub_tiles = tj_blk // sub_w
    # NOTE(v7x): dst axis is "parallel" (megacore-sharded); keep n_pad // ti
    # even when tuning ti so both TensorCores stay balanced.
    grid = (n_pad // ti, n_pad // tj_blk)
    kernel = functools.partial(_gatv2_attn_kernel, heads=heads, chan=chan,
                               sub_tiles=sub_tiles, sub_w=sub_w)
    return pl.pallas_call(
        kernel,
        out_shape=jax.ShapeDtypeStruct((n_pad, hcdim), jnp.float32),
        grid_spec=pltpu.PrefetchScalarGridSpec(
            num_scalar_prefetch=0,
            grid=grid,
            in_specs=[
                pl.BlockSpec(memory_space=pltpu.MemorySpace.SMEM),      # att
                pl.BlockSpec((ti, hcdim), lambda i, j: (i, 0)),         # xr
                pl.BlockSpec((hcdim, tj_blk), lambda i, j: (0, j)),     # xl^T
                pl.BlockSpec((tj_blk, hcdim), lambda i, j: (j, 0)),     # xl bf16
                pl.BlockSpec((ti, tj_blk), lambda i, j: (i, j)),        # adj int8
            ],
            out_specs=pl.BlockSpec((ti, hcdim), lambda i, j: (i, 0)),
            scratch_shapes=[
                pltpu.VMEM((ti, hcdim), jnp.float32),   # running max
                pltpu.VMEM((ti, hcdim), jnp.float32),   # running denominator
                pltpu.VMEM((ti, hcdim), jnp.float32),   # output accumulator
            ],
        ),
        compiler_params=pltpu.CompilerParams(
            dimension_semantics=("parallel", "arbitrary"),
            vmem_limit_bytes=64 * 1024 * 1024),
    )(att.astype(jnp.float32), xr, xlT, xlv, adj_i8)


# ------------------------------- model glue ----------------------------------

def to_homogeneous(node_emb_dict, edge_dict):
    num_node_dict = {t: v.shape[0] for t, v in node_emb_dict.items()}
    offset_dict, offset = {}, 0
    for t, n in num_node_dict.items():
        offset_dict[t] = offset
        offset += n
    node_range_dict, start = {}, 0
    for t, n in num_node_dict.items():
        node_range_dict[t] = (start, start + n - 1)
        start += n
    node_emb = jnp.concatenate(list(node_emb_dict.values()), axis=0)
    offset_edges = []
    for edge_type, edge in edge_dict.items():
        s_t, d_t = edge_type[0], edge_type[-1]
        offset_edges.append(jnp.stack([edge[0] + offset_dict[s_t],
                                       edge[1] + offset_dict[d_t]]))
    edge = jnp.concatenate(offset_edges, axis=1)
    return node_emb, node_range_dict, edge


def to_heterogeneous_node_embedding(node_emb, node_range_dict):
    return {t: node_emb[s:e + 1, :] for t, (s, e) in node_range_dict.items()}


def edges_to_adj(edge, num_real, n_pad):
    # int8 dense mask, adj[dst, src] = 1; self loops on real nodes only, so
    # padded rows/cols stay fully masked (required for correct padding).
    adj = jnp.zeros((n_pad, n_pad), jnp.int8)
    adj = adj.at[edge[1], edge[0]].set(jnp.int8(1))
    idx = jnp.arange(num_real)
    adj = adj.at[idx, idx].set(jnp.int8(1))
    return adj


def gatv2_conv(x, p, adj_i8, heads, concat):
    hc = p["Wl"].shape[1]
    chan = hc // heads
    # Fused lin_l | lin_r projection: one matmul, one DMA of x, emits the bf16
    # value matrix directly (no host slices / casts of the projection).
    xl, xr, xlv = pallas_gat_projection(x, p["Wl"], p["bl"], p["Wr"], p["br"])
    out = pallas_gatv2_attention(p["att"].reshape(-1), xr, xl.T, xlv, adj_i8,
                                 heads, chan)     # [N_pad, H*C] concat layout
    if not concat:
        out = out.reshape(out.shape[0], heads, chan).mean(axis=1)
    return out + p["bias"][None, :]


def gatv2_forward(params, x_dict, edge_dict, heads):
    # per-node-type input linear
    h_dict = {t: pallas_linear(x, params["in"][t]["W"], params["in"][t]["b"])
              for t, x in x_dict.items()}
    h, node_range_dict, edge = to_homogeneous(h_dict, edge_dict)
    n = h.shape[0]
    n_pad = _round_up(max(n, TILE_DST), TILE_DST)
    h = jnp.pad(h, ((0, n_pad - n), (0, 0)))
    adj = edges_to_adj(edge, n, n_pad)
    num_layers = len(params["gat"])
    for i, lp in enumerate(params["gat"]):
        last = i == num_layers - 1
        h = gatv2_conv(h, lp, adj, heads, concat=not last)
        if not last:
            h = jax.nn.relu(h)
    return to_heterogeneous_node_embedding(h[:n], node_range_dict)


# ------------------------------- param init ----------------------------------

def kaiming_uniform(key, fan_in, shape):
    bound = jnp.sqrt(6.0 / fan_in)
    return jax.random.uniform(key, shape, jnp.float32, -bound, bound)


def glorot_uniform(key, fan_in, fan_out, shape):
    bound = jnp.sqrt(6.0 / (fan_in + fan_out))
    return jax.random.uniform(key, shape, jnp.float32, -bound, bound)


def init_params(key, in_dims, hidden, out_dim, heads, num_layers):
    params = {"in": {}, "gat": []}
    for t, d in in_dims.items():
        key, k = jax.random.split(key)
        params["in"][t] = {"W": kaiming_uniform(k, d, (d, hidden)),
                           "b": jnp.zeros((hidden,), jnp.float32)}
    in_c = hidden
    for layer in range(num_layers):
        last = (layer == num_layers - 1)
        per_head = out_dim if last else hidden // heads
        key, k1, k2, k3 = jax.random.split(key, 4)
        params["gat"].append({
            "Wl": glorot_uniform(k1, in_c, heads * per_head,
                                 (in_c, heads * per_head)),
            "bl": jnp.zeros((heads * per_head,), jnp.float32),
            "Wr": glorot_uniform(k2, in_c, heads * per_head,
                                 (in_c, heads * per_head)),
            "br": jnp.zeros((heads * per_head,), jnp.float32),
            "att": glorot_uniform(k3, per_head, 1, (heads, per_head)),
            "bias": jnp.zeros((out_dim if last else hidden,), jnp.float32),
        })
        in_c = hidden
    return params


# --------------------------------- main ---------------------------------------

if __name__ == "__main__":
    node_type_list = ["a", "b"]
    encoder_hidden_dim = 32
    encoder_out_dim = 16
    num_local_head = 4
    num_local_layer = 2

    num_nodes = {"a": 8, "b": 8}
    feat_dims = {"a": 12, "b": 20}
    num_edges = 10

    key = jax.random.PRNGKey(0)

    x_dict = {}
    for t in node_type_list:
        key, k = jax.random.split(key)
        x_dict[t] = jax.random.normal(k, (num_nodes[t], feat_dims[t]),
                                      jnp.float32)

    def make_edges(k, n_src, n_dst, n_e):
        k1, k2 = jax.random.split(k)
        src = jax.random.randint(k1, (n_e,), 0, n_src, jnp.int32)
        dst = jax.random.randint(k2, (n_e,), 0, n_dst, jnp.int32)
        return jnp.stack([src, dst])

    edge_dict = {}
    for et in [("a", "to", "a"), ("a", "to", "b"), ("b", "to", "a")]:
        key, k = jax.random.split(key)
        edge_dict[et] = make_edges(k, num_nodes[et[0]], num_nodes[et[-1]],
                                   num_edges)

    key, kp = jax.random.split(key)
    params = init_params(kp, feat_dims, encoder_hidden_dim, encoder_out_dim,
                         num_local_head, num_local_layer)

    z_dict = gatv2_forward(params, x_dict, edge_dict, num_local_head)
    z_dict = jax.tree_util.tree_map(jax.block_until_ready, z_dict)

    ok = True
    for t in node_type_list:
        z = z_dict[t]
        if z.shape != (num_nodes[t], encoder_out_dim):
            ok = False
        if not bool(jnp.all(jnp.isfinite(z))):
            ok = False
    if ok:
        print("KERNEL_OK")
    else:
        print("KERNEL_FAIL")
</pallas_src>

<mosaic_0001>
module attributes {stable_mosaic.version = 11 : i64} {
  func.func @_linear_kernel(%arg0: i32, %arg1: memref<8x12xf32, #tpu.memory_space<vmem>>, %arg2: memref<12x32xf32, #tpu.memory_space<vmem>>, %arg3: memref<1x32xf32, #tpu.memory_space<vmem>>, %arg4: memref<8x32xf32, #tpu.memory_space<vmem>>) attributes {dimension_semantics = [#tpu.dimension_semantics<parallel>], iteration_bounds = array<i64: 1>, scalar_prefetch = 0 : i64, scratch_operands = 0 : i64, tpu.core_type = #tpu.core_type<tc>, window_params = [{transform_indices = @transform_0, window_bounds = array<i64: 8, 12>}, {pipeline_mode = #tpu.pipeline_mode<synchronous>, transform_indices = @transform_1, window_bounds = array<i64: 12, 32>}, {pipeline_mode = #tpu.pipeline_mode<synchronous>, transform_indices = @transform_2, window_bounds = array<i64: 1, 32>}, {transform_indices = @transform_3, window_bounds = array<i64: 8, 32>}]} {
    %c0 = arith.constant 0 : index
    %c0_0 = arith.constant 0 : index
    %0 = vector.load %arg1[%c0, %c0_0] : memref<8x12xf32, #tpu.memory_space<vmem>>, vector<8x12xf32>
    %1 = arith.truncf %0 : vector<8x12xf32> to vector<8x12xbf16>
    %c0_1 = arith.constant 0 : index
    %c0_2 = arith.constant 0 : index
    %2 = vector.load %arg2[%c0_1, %c0_2] : memref<12x32xf32, #tpu.memory_space<vmem>>, vector<12x32xf32>
    %3 = arith.truncf %2 : vector<12x32xf32> to vector<12x32xbf16>
    %cst = arith.constant dense<0.000000e+00> : vector<8x32xf32>
    %4 = tpu.matmul %1, %3, %cst {dimension_numbers = #tpu.dot_dimension_numbers<[1], [0], [0], [1], [0, 0, 1, 1], [], []>} : vector<8x12xbf16>, vector<12x32xbf16>, vector<8x32xf32> -> vector<8x32xf32>
    %c0_3 = arith.constant 0 : index
    %c0_4 = arith.constant 0 : index
    %5 = vector.load %arg3[%c0_3, %c0_4] : memref<1x32xf32, #tpu.memory_space<vmem>>, vector<1x32xf32>
    %6 = vector.broadcast %5 : vector<1x32xf32> to vector<8x32xf32>
    %7 = arith.addf %4, %6 : vector<8x32xf32>
    %c0_5 = arith.constant 0 : index
    %c0_6 = arith.constant 0 : index
    %8 = vector.load %arg4[%c0_5, %c0_6] : memref<8x32xf32, #tpu.memory_space<vmem>>, vector<8x32xf32>
    tpu.vector_store %arg4[%c0_5, %c0_6], %7 {strides = array<i32>} : memref<8x32xf32, #tpu.memory_space<vmem>>, vector<8x32xf32>,
    return
  }
  func.func @transform_0(%arg0: i32) -> (i32, i32) {
    %c0_i32 = arith.constant 0 : i32
    %c0_i32_0 = arith.constant 0 : i32
    return %arg0, %c0_i32 : i32, i32
  }
  func.func @transform_1(%arg0: i32) -> (i32, i32) {
    %c0_i32 = arith.constant 0 : i32
    %c0_i32_0 = arith.constant 0 : i32
    %c0_i32_1 = arith.constant 0 : i32
    return %c0_i32, %c0_i32_0 : i32, i32
  }
  func.func @transform_2(%arg0: i32) -> (i32, i32) {
    %c0_i32 = arith.constant 0 : i32
    %c0_i32_0 = arith.constant 0 : i32
    %c0_i32_1 = arith.constant 0 : i32
    return %c0_i32, %c0_i32_0 : i32, i32
  }
  func.func @transform_3(%arg0: i32) -> (i32, i32) {
    %c0_i32 = arith.constant 0 : i32
    %c0_i32_0 = arith.constant 0 : i32
    return %arg0, %c0_i32 : i32, i32
  }
}

</mosaic_0001>

<bundles_post_ra>
// kernel: tpu_custom_call.1
= control target key start
LH: loop header
LB: loop body
LE: loop exit
PB: predicated region body
PF: predicated region fallthrough
CT: control target
= control target key end

     0   :  { %8 = vsyncpa [#allocation3], 0  ;;  %s282_s0 = inlined_call_operand.hbm [shape: f32[8,12], index: 0, kind: input, shape index: {}]   ;;  %s283_s1 = inlined_call_operand.hbm [shape: f32[12,32], index: 1, kind: input, shape index: {}]   ;;  %s284_s2 = inlined_call_operand.vmem [shape: f32[1,32], index: 2, kind: input, shape index: {}]   ;;  %s285_s3 = inlined_call_operand.hbm [shape: f32[8,32], index: 3, kind: output, shape index: {}]  }
   0x1   :  { %9 = vsyncpa [#allocation6], 0 }
   0x2   :  { %10 = vsyncpa [#allocation4], 0  ;;  %s209_s12 = smov [#allocation2]   ;;  %s210_s14 = smov [#allocation5]  }
   0x3   :  { %s17_s13 = sshll.u32 %s209_s12, 4  ;;  %s26_s15 = sshll.u32 %s210_s14, 4  ;;  %s18_s13 = int_to_ptr.vmem [resolvable:$true] %s17_s13  ;;  %s236_s15 = int_to_ptr.vmem [resolvable:$true] %s26_s15 }
   0x4   :  { %s137_s18 = scalar_lea.hbm %s282_s0, 128 }
   0x5   :  { %p138_p0 = scmp.ne.s32.totalorder %s282_s0, %s137_s18  ;;  %p141_p1 = scmp.lt.u32.totalorder %s137_s18, %s282_s0 }
   0x7   :  { %p143_p2 = pnand %p141_p1, %p138_p0 }
   0x9   :  { %146 = shalt.err (!%p143_p2)
}
   0xa   :  { %s147_s23 = scalar_lea.vmem %s18_s13, 128  ;;  %p152_p4 = scmp.lt.s32.totalorder %s18_s13, %s18_s13 }
   0xb   :  { %p148_p3 = scmp.ne.s32.totalorder %s18_s13, %s147_s23  ;;  %p153_p5 = scmp.lt.s32.totalorder %s147_s23, %s147_s23 }
   0xd   :  { %p154_p6 = por %p153_p5, %p152_p4 }
   0xf   :  { %p155_p7 = pnand %p154_p6, %p148_p3 }
  0x11   :  { %158 = shalt.err (!%p155_p7)
}
  0x12   :  { %20 = dma.hbm_to_vmem [thread:$0]  %s282_s0, 128, %s18_s13, [#allocation3]  }
  0x13   :  { %s159_s28 = scalar_lea.hbm %s283_s1, 256 }
  0x14   :  { %p160_p8 = scmp.ne.s32.totalorder %s283_s1, %s159_s28  ;;  %p163_p9 = scmp.lt.u32.totalorder %s159_s28, %s283_s1 }
  0x16   :  { %p165_p10 = pnand %p163_p9, %p160_p8 }
  0x18   :  { %168 = shalt.err (!%p165_p10)
}
  0x19   :  { %s169_s6 = scalar_lea.vmem %s236_s15, 256  ;;  %p174_p12 = scmp.lt.s32.totalorder %s236_s15, %s236_s15 }
  0x1a   :  { %p170_p11 = scmp.ne.s32.totalorder %s236_s15, %s169_s6  ;;  %p175_p13 = scmp.lt.s32.totalorder %s169_s6, %s169_s6 }
  0x1c   :  { %p176_p0 = por %p175_p13, %p174_p12 }
  0x1e   :  { %p177_p1 = pnand %p176_p0, %p170_p11 }
  0x20   :  { %180 = shalt.err (!%p177_p1)
}
  0x21   :  { %s211_s0 = smov 128   ;;  %s212_s7 = smov 8  }
  0x22   :  { %32 = dma.hbm_to_vmem [thread:$0]  %s283_s1, 256, %s236_s15, [#allocation6], %s211_s0, %s211_s0, %s212_s7  }
  0x23   :  { %203 = dma.done.wait [#allocation3], 128  }
  0x24   :  { %204 = vsyncadd [#allocation3], 4294967168 }
  0x25   :  { %205 = dma.done.wait [#allocation6], 256  }
  0x26   :  { %206 = vsyncadd [#allocation6], 4294967040  ;;  %v213_v0 = vmov 0.0   ;;  %vm214_vm0 = vmmov 0   ;;  %v44_v1 = vld [vmem:[#allocation5] sm:$0xff]  ;;  %vm58_vm1 = vcmask 1045504  }
  0x27   :  { %124 = vmatprep.subr.bf16.mxu0 %v213_v0  ;;  %126 = vmatprep.mubr.msk.bf16.mxu0 %vm214_vm0, %v213_v0  ;;  %v45_v2 = vld [vmem:[#allocation5 + $0x8] sm:$0xf]  ;;  %v42_v3 = vld [vmem:[#allocation2] sm:$0xff]  ;;  %vm54_vm2 = vcmask 97280   ;;  %s215_s11 = smov [#allocation7]   ;;  %vm102_vm3 = vcmask 261120  }
  0x28   :  { %v46_v4 = vpack.c.bf16 %v45_v2, %v44_v1  ;;  %v43_v6 = vpack.c.bf16 %v42_v3, %v42_v3  ;;  %v120_v7 = vld [vmem:[%s284_s2] ss:$0 sm:$0xff]  ;;  %s110_s12 = sshll.u32 %s215_s11, 4  ;;  %s111_s12 = int_to_ptr.vmem [resolvable:$true] %s110_s12 }
  0x29   :  { %s181_s13 = scalar_lea.vmem %s111_s12, 128  ;;  %p186_p3 = scmp.lt.s32.totalorder %s111_s12, %s111_s12 }
  0x2a   :  { %v60_v5 = vsel %vm58_vm1, %v46_v4, 0  ;;  %p182_p2 = scmp.ne.s32.totalorder %s111_s12, %s181_s13  ;;  %p187_p4 = scmp.lt.s32.totalorder %s181_s13, %s181_s13 }
  0x2b   :  { %125 = vmatpush3.bf16.msra.mxu0 %v60_v5 }
  0x2c   :  { %p188_p5 = por %p187_p4, %p186_p3 }
  0x2e   :  { %127 = vmatmul.mubr.msk.bf16.vlgmr.msra.gmra.mrb[0].mxu0 %vm54_vm2, %v43_v6  ;;  %p189_p6 = pnand %p188_p5, %p182_p2 }
 0x101   :  { %v96_v8 = vpop.f32.mrb[0].mxu0 }
 0x102   :  { %v97_v9 = vadd.f32 %v120_v7, %v96_v8  ;;  %v128_v10 = vpop.f32.mrb[1].mxu0 }
 0x103   :  { %v99_v11 = vpop.f32.mrb[2].mxu0 }
 0x104   :  { %v129_v12 = vpop.f32.mrb[3].mxu0  ;;  %103 = vst.msk [vmem:[#allocation7] sm:$0xff] %vm102_vm3, %v97_v9 }
 0x105   :  { %192 = shalt.err (!%p189_p6)
}
 0x106   :  { %s193_s2 = scalar_lea.hbm %s285_s3, 128 }
 0x107   :  { %p194_p7 = scmp.ne.s32.totalorder %s285_s3, %s193_s2  ;;  %p197_p8 = scmp.lt.u32.totalorder %s193_s2, %s285_s3 }
 0x109   :  { %p199_p9 = pnand %p197_p8, %p194_p7 }
 0x10b   :  { %202 = shalt.err (!%p199_p9)
}
 0x10c   :  { %113 = dma.vmem_to_hbm [thread:$0]  %s111_s12, 128, %s285_s3, [#allocation4]  }
 0x10d   :  { %207 = dma.done.wait [#allocation4], 128  }
 0x10e   :  { %208 = vsyncadd [#allocation4], 4294967168 }
 0x10f   :  { %117 = vsyncpa [#allocation3], 1 }
 0x110   :  { %118 = vsyncpa [#allocation6], 1 }
 0x111   :  { %119 = vsyncpa [#allocation4], 1 }

</bundles_post_ra>
